<compile_context>
chip_gen: v6e
topology: v6e:2x2x1
jax: 0.10.0
libtpu: 0.0.40
codegen_flags: <defaults>
</compile_context>

<pallas_src>
import math

import jax
import jax.numpy as jnp
from jax.experimental import pallas as pl
from jax.experimental.pallas import tpu as pltpu

# Small, module-consistent shapes (hidden_size=768 -> 32 for the synthetic run).
B, S, H, NH, DH, FFN, C, VOCAB = 2, 8, 32, 2, 16, 64, 3, 100
C_PAD = 128             # lane-dense classifier output width (sliced back to C)
LN_EPS = 1e-12          # BERT layer-norm eps
NEG_MASK = -10000.0     # additive bias for masked-out key positions

# ---- packed f32 "vector" slab: LN gammas/betas + every bias, one row each ----
(_R_LN0G, _R_LN0B, _R_BQKV, _R_BO, _R_LN1G, _R_LN1B,
 _R_B1, _R_B2, _R_LN2G, _R_LN2B, _R_BP, _R_BC) = range(12)
VEC_ROWS, VEC_COLS = 16, 128                 # padded to an (8,128)-friendly tile

# ---- packed bf16 weight slab row offsets (all multiples of 16 sublanes) ------
_W_QKV, _W_O, _W_1, _W_2, _W_P, _W_C = 0, 32, 64, 96, 160, 192
W_ROWS, W_COLS = 224, 128


def bert_classifier_kernel(
    valid_ref,                     # SMEM (B,) int32        — valid_length
    emb_ref,                       # VMEM (B*S, H) f32      — word+pos+type embeddings
    vec_ref,                       # VMEM (16, 128) f32     — packed biases / LN params
    w_ref,                         # VMEM (224, 128) bf16   — packed weights
    out_ref,                       # VMEM (B, C_PAD) f32    — padded logits
    x_scr,                         # VMEM (B*S, H) f32      — scratch for CLS extraction
):
    f32, bf16 = jnp.float32, jnp.bfloat16

    def vrow(r, width):                           # static slab views
        return vec_ref[r:r + 1, 0:width]          # (1, width) f32

    def layernorm(x, gr, br):
        mu = jnp.mean(x, axis=-1, keepdims=True)
        var = jnp.mean((x - mu) ** 2, axis=-1, keepdims=True)
        return (x - mu) * jax.lax.rsqrt(var + LN_EPS) * vrow(gr, H) + vrow(br, H)

    # ---- embeddings + LayerNorm (f32 elementwise) ----------------------------
    x2 = layernorm(emb_ref[...], _R_LN0G, _R_LN0B)                    # (B*S, H)

    # ---- attention-mask bias, one shot, kept at (B*NH, 1, S) -----------------
    # gen_attention_mask: key positions < valid_length[b] -> 0, else -10000.
    NB = NH * B                                      # head-major, batch-minor
    key_pos = jax.lax.broadcasted_iota(jnp.int32, (NB, 1, S), 2)
    batch_ix = jax.lax.broadcasted_iota(jnp.int32, (NB, 1, S), 0) % B
    vl = jnp.full((NB, 1, S), valid_ref[0], jnp.int32)
    for b in range(1, B):                            # B-1 selects from SMEM scalars
        vl = jnp.where(batch_ix == b, valid_ref[b], vl)
    bias = jnp.where(key_pos < vl, 0.0, NEG_MASK)                     # (NB, 1, S)

    # ---- fused QKV projection (single matmul; scale folded into W_q/b_q) -----
    qkv = jnp.dot(x2.astype(bf16), w_ref[_W_QKV:_W_QKV + H, 0:3 * H],
                  preferred_element_type=f32) + vrow(_R_BQKV, 3 * H)  # (B*S, 3H)
    qkv = qkv.astype(bf16)

    # ---- split heads into (B*NH, S, DH): lane slices + one leading concat ----
    blocks = []
    for col0 in (0, H, 2 * H):                       # q | k | v columns
        for h in range(NH):
            c = col0 + h * DH
            blocks.append(qkv[:, c:c + DH].reshape(B, S, DH))
    qkvh = jnp.concatenate(blocks, axis=0)                            # (3*NB,S,DH)
    q, k, v = qkvh[0:NB], qkvh[NB:2 * NB], qkvh[2 * NB:3 * NB]

    # ---- ONE batched attention over all (head, batch) pairs ------------------
    s = jnp.einsum('nqd,nkd->nqk', q, k, preferred_element_type=f32) + bias
    s = s - jnp.max(s, axis=-1, keepdims=True)
    p = jnp.exp(s)                                                    # f32 on EUP
    p = p * pl.reciprocal(jnp.sum(p, axis=-1, keepdims=True), approx=True)
    ctx = jnp.einsum('nqk,nkd->nqd', p.astype(bf16), v,
                     preferred_element_type=f32).astype(bf16)         # (NB, S, DH)

    # heads back to columns -> ONE (B*S,H) @ (H,H) output projection
    ctx_cols = jnp.concatenate(
        [ctx[h * B:(h + 1) * B].reshape(B * S, DH) for h in range(NH)], axis=1)
    attn = jnp.dot(ctx_cols, w_ref[_W_O:_W_O + H, 0:H],
                   preferred_element_type=f32) + vrow(_R_BO, H)
    x2 = layernorm(x2 + attn, _R_LN1G, _R_LN1B)

    # ---- feed-forward ---------------------------------------------------------
    hmid = jnp.dot(x2.astype(bf16), w_ref[_W_1:_W_1 + H, 0:FFN],
                   preferred_element_type=f32) + vrow(_R_B1, FFN)
    # TODO(synk): tanh-approx GELU kept (EUP-friendly); use approximate=False
    # (exact erf) when matching a pretrained torch nn.GELU BERT exactly.
    hmid = jax.nn.gelu(hmid)
    ffn = jnp.dot(hmid.astype(bf16), w_ref[_W_2:_W_2 + FFN, 0:H],
                  preferred_element_type=f32) + vrow(_R_B2, H)
    x2 = layernorm(x2 + ffn, _R_LN2G, _R_LN2B)

    # ---- pooler: tanh(W @ [CLS]) via sublane-strided scratch load ------------
    x_scr[...] = x2
    cls = x_scr[pl.ds(0, B, stride=S), :]                             # rows 0, S
    pooled = jnp.tanh(jnp.dot(cls.astype(bf16), w_ref[_W_P:_W_P + H, 0:H],
                              preferred_element_type=f32) + vrow(_R_BP, H))

    # dropout(p=dr_rate) in inference/eval mode is the identity.
    # TODO(synk): train-mode dropout RNG (torch.nn.Dropout) not reproduced.

    # ---- classifier = nn.Linear(hidden_size, num_classes), lane-dense --------
    out_ref[...] = jnp.dot(pooled.astype(bf16), w_ref[_W_C:_W_C + H, 0:C_PAD],
                           preferred_element_type=f32) + vrow(_R_BC, C_PAD)


def _prep_kernel_params(params):
    """Fuse / pre-scale / pad all parameters into two slabs on the host side."""
    f32 = jnp.float32
    scale = 1.0 / math.sqrt(DH)

    # f32 vector slab: one row per LN-gamma/beta/bias, padded to 128 lanes.
    bqkv = jnp.concatenate(
        [params["bq"] * scale, params["bk"], params["bv"]], axis=1)   # (1, 3H)
    bc_pad = jnp.zeros((1, C_PAD), f32).at[:, :C].set(params["bc"])
    vec_rows = {
        _R_LN0G: params["ln0_g"], _R_LN0B: params["ln0_b"],
        _R_BQKV: bqkv,            _R_BO: params["bo"],
        _R_LN1G: params["ln1_g"], _R_LN1B: params["ln1_b"],
        _R_B1: params["b1"],      _R_B2: params["b2"],
        _R_LN2G: params["ln2_g"], _R_LN2B: params["ln2_b"],
        _R_BP: params["bp"],      _R_BC: bc_pad,
    }
    vec = jnp.zeros((VEC_ROWS, VEC_COLS), f32)
    for r, val in vec_rows.items():
        vec = vec.at[r, :val.shape[1]].set(val[0])

    # bf16 weight slab: weights stacked along rows, padded to 128 lanes.
    wqkv = jnp.concatenate(
        [params["wq"] * scale, params["wk"], params["wv"]], axis=1)   # (H, 3H)
    wc_pad = jnp.zeros((H, C_PAD), f32).at[:, :C].set(params["wc"])
    w = jnp.zeros((W_ROWS, W_COLS), f32)
    w = w.at[_W_QKV:_W_QKV + H, :3 * H].set(wqkv)
    w = w.at[_W_O:_W_O + H, :H].set(params["wo"])
    w = w.at[_W_1:_W_1 + H, :FFN].set(params["w1"])
    w = w.at[_W_2:_W_2 + FFN, :H].set(params["w2"])
    w = w.at[_W_P:_W_P + H, :H].set(params["wp"])
    w = w.at[_W_C:_W_C + H, :C_PAD].set(wc_pad)
    return vec, w.astype(jnp.bfloat16)


def bert_classifier_forward(token_ids, valid_length, segment_ids, params):
    # Glue (embedding gathers / parameter packing+cast) stays in plain JAX.
    emb = (params["word_emb"][token_ids]
           + params["pos_emb"][jnp.arange(S)][None, :, :]
           + params["type_emb"][segment_ids]).astype(jnp.float32)
    emb = emb.reshape(B * S, H)
    vec_slab, w_slab = _prep_kernel_params(params)

    vmem = pl.BlockSpec(memory_space=pltpu.MemorySpace.VMEM)
    smem = pl.BlockSpec(memory_space=pltpu.MemorySpace.SMEM)

    logits_pad = pl.pallas_call(
        bert_classifier_kernel,
        out_shape=jax.ShapeDtypeStruct((B, C_PAD), jnp.float32),
        in_specs=[smem, vmem, vmem, vmem],
        out_specs=vmem,
        scratch_shapes=[pltpu.VMEM((B * S, H), jnp.float32)],
    )(valid_length.astype(jnp.int32), emb, vec_slab, w_slab)
    return logits_pad[:, :C]


def init_params(key):
    names_shapes = {
        "word_emb": (VOCAB, H), "pos_emb": (S, H), "type_emb": (2, H),
        "wq": (H, H), "wk": (H, H), "wv": (H, H), "wo": (H, H),
        "w1": (H, FFN), "w2": (FFN, H),
        "wp": (H, H), "wc": (H, C),
    }
    params = {}
    keys = jax.random.split(key, len(names_shapes))
    for k, (name, shp) in zip(keys, names_shapes.items()):
        params[name] = 0.02 * jax.random.normal(k, shp, dtype=jnp.float32)
    for name, dim in [("bq", H), ("bk", H), ("bv", H), ("bo", H),
                      ("b1", FFN), ("b2", H), ("bp", H), ("bc", C)]:
        params[name] = jnp.zeros((1, dim), jnp.float32)
    for name in ["ln0", "ln1", "ln2"]:
        params[name + "_g"] = jnp.ones((1, H), jnp.float32)
        params[name + "_b"] = jnp.zeros((1, H), jnp.float32)
    return params


if __name__ == "__main__":
    key = jax.random.PRNGKey(0)
    kp, kt = jax.random.split(key)
    params = init_params(kp)

    token_ids = jax.random.randint(kt, (B, S), 0, VOCAB, dtype=jnp.int32)
    segment_ids = jnp.zeros((B, S), dtype=jnp.int32)
    valid_length = jnp.array([5, 8], dtype=jnp.int32)

    logits = bert_classifier_forward(token_ids, valid_length, segment_ids, params)
    jax.block_until_ready(logits)
    assert logits.shape == (B, C) and logits.dtype == jnp.float32
    print("KERNEL_OK")
</pallas_src>

<mosaic_0001>
module attributes {stable_mosaic.version = 11 : i64} {
  func.func @bert_classifier_kernel(%arg0: memref<2xi32, #tpu.memory_space<smem>>, %arg1: memref<16x32xf32, #tpu.memory_space<vmem>>, %arg2: memref<16x128xf32, #tpu.memory_space<vmem>>, %arg3: memref<224x128xbf16, #tpu.memory_space<vmem>>, %arg4: memref<2x128xf32, #tpu.memory_space<vmem>>, %arg5: memref<16x32xf32, #tpu.memory_space<vmem>>) attributes {dimension_semantics = [], scalar_prefetch = 0 : i64, scratch_operands = 1 : i64, tpu.core_type = #tpu.core_type<tc>} {
    %c0 = arith.constant 0 : index
    %c0_0 = arith.constant 0 : index
    %0 = vector.load %arg1[%c0, %c0_0] : memref<16x32xf32, #tpu.memory_space<vmem>>, vector<16x32xf32>
    %cst = arith.constant dense<0.000000e+00> : vector<16xf32>
    %1 = vector.multi_reduction <add>, %0, %cst [1] : vector<16x32xf32> to vector<16xf32>
    %2 = vector.shape_cast %1 : vector<16xf32> to vector<16x1xf32>
    %cst_1 = arith.constant 3.200000e+01 : f32
    %3 = vector.broadcast %cst_1 : f32 to vector<16x1xf32>
    %4 = arith.divf %2, %3 : vector<16x1xf32>
    %5 = vector.broadcast %4 : vector<16x1xf32> to vector<16x32xf32>
    %6 = arith.subf %0, %5 : vector<16x32xf32>
    %7 = arith.mulf %6, %6 : vector<16x32xf32>
    %cst_2 = arith.constant dense<0.000000e+00> : vector<16xf32>
    %8 = vector.multi_reduction <add>, %7, %cst_2 [1] : vector<16x32xf32> to vector<16xf32>
    %9 = vector.shape_cast %8 : vector<16xf32> to vector<16x1xf32>
    %cst_3 = arith.constant 3.200000e+01 : f32
    %10 = vector.broadcast %cst_3 : f32 to vector<16x1xf32>
    %11 = arith.divf %9, %10 : vector<16x1xf32>
    %12 = vector.broadcast %4 : vector<16x1xf32> to vector<16x32xf32>
    %13 = arith.subf %0, %12 : vector<16x32xf32>
    %cst_4 = arith.constant 9.99999996E-13 : f32
    %14 = vector.broadcast %cst_4 : f32 to vector<16x1xf32>
    %15 = arith.addf %11, %14 : vector<16x1xf32>
    %16 = math.rsqrt %15 : vector<16x1xf32>
    %17 = vector.broadcast %16 : vector<16x1xf32> to vector<16x32xf32>
    %18 = arith.mulf %13, %17 : vector<16x32xf32>
    %c0_5 = arith.constant 0 : index
    %c0_6 = arith.constant 0 : index
    %19 = vector.load %arg2[%c0_5, %c0_6] : memref<16x128xf32, #tpu.memory_space<vmem>>, vector<1x32xf32>
    %20 = vector.broadcast %19 : vector<1x32xf32> to vector<16x32xf32>
    %21 = arith.mulf %18, %20 : vector<16x32xf32>
    %c1 = arith.constant 1 : index
    %c0_7 = arith.constant 0 : index
    %22 = vector.load %arg2[%c1, %c0_7] : memref<16x128xf32, #tpu.memory_space<vmem>>, vector<1x32xf32>
    %23 = vector.broadcast %22 : vector<1x32xf32> to vector<16x32xf32>
    %24 = arith.addf %21, %23 : vector<16x32xf32>
    %25 = tpu.iota {dimensions = array<i32: 2>} : vector<4x1x8xi32>
    %26 = tpu.iota {dimensions = array<i32: 0>} : vector<4x1x8xi32>
    %c2_i32 = arith.constant 2 : i32
    %c0_i32 = arith.constant 0 : i32
    %27 = arith.cmpi eq, %c2_i32, %c0_i32 : i32
    %c1_i32 = arith.constant 1 : i32
    %28 = arith.select %27, %c1_i32, %c2_i32 : i32
    %29 = vector.broadcast %28 : i32 to vector<4x1x8xi32>
    %30 = arith.remsi %26, %29 : vector<4x1x8xi32>
    %c0_i32_8 = arith.constant 0 : i32
    %31 = vector.broadcast %c0_i32_8 : i32 to vector<4x1x8xi32>
    %32 = arith.cmpi ne, %30, %31 : vector<4x1x8xi32>
    %c0_i32_9 = arith.constant 0 : i32
    %33 = vector.broadcast %c0_i32_9 : i32 to vector<4x1x8xi32>
    %34 = arith.cmpi slt, %30, %33 : vector<4x1x8xi32>
    %c0_i32_10 = arith.constant 0 : i32
    %35 = arith.cmpi slt, %28, %c0_i32_10 : i32
    %36 = vector.broadcast %35 : i1 to vector<4x1x8xi1>
    %37 = vector.broadcast %36 : vector<4x1x8xi1> to vector<4x1x8xi1>
    %38 = arith.xori %34, %37 : vector<4x1x8xi1>
    %39 = arith.andi %38, %32 : vector<4x1x8xi1>
    %40 = vector.broadcast %28 : i32 to vector<4x1x8xi32>
    %41 = arith.addi %30, %40 : vector<4x1x8xi32>
    %42 = arith.select %39, %41, %30 : vector<4x1x8xi1>, vector<4x1x8xi32>
    %c0_11 = arith.constant 0 : index
    %43 = memref.load %arg0[%c0_11] : memref<2xi32, #tpu.memory_space<smem>>
    %44 = vector.broadcast %43 : i32 to vector<4x1x8xi32>
    %c1_i32_12 = arith.constant 1 : i32
    %45 = vector.broadcast %c1_i32_12 : i32 to vector<4x1x8xi32>
    %46 = arith.cmpi eq, %42, %45 : vector<4x1x8xi32>
    %c1_13 = arith.constant 1 : index
    %47 = memref.load %arg0[%c1_13] : memref<2xi32, #tpu.memory_space<smem>>
    %48 = vector.broadcast %47 : i32 to vector<4x1x8xi32>
    %49 = arith.select %46, %48, %44 : vector<4x1x8xi1>, vector<4x1x8xi32>
    %50 = arith.cmpi slt, %25, %49 : vector<4x1x8xi32>
    %cst_14 = arith.constant 0.000000e+00 : f32
    %cst_15 = arith.constant -1.000000e+04 : f32
    %51 = vector.broadcast %cst_14 : f32 to vector<4x1x8xf32>
    %52 = vector.broadcast %cst_15 : f32 to vector<4x1x8xf32>
    %53 = arith.select %50, %51, %52 : vector<4x1x8xi1>, vector<4x1x8xf32>
    %54 = arith.truncf %24 : vector<16x32xf32> to vector<16x32xbf16>
    %c0_16 = arith.constant 0 : index
    %c0_17 = arith.constant 0 : index
    %55 = vector.load %arg3[%c0_16, %c0_17] : memref<224x128xbf16, #tpu.memory_space<vmem>>, vector<32x96xbf16>
    %cst_18 = arith.constant dense<0.000000e+00> : vector<16x96xf32>
    %56 = tpu.matmul %54, %55, %cst_18 {dimension_numbers = #tpu.dot_dimension_numbers<[1], [0], [0], [1], [0, 0, 1, 1], [], []>} : vector<16x32xbf16>, vector<32x96xbf16>, vector<16x96xf32> -> vector<16x96xf32>
    %c2 = arith.constant 2 : index
    %c0_19 = arith.constant 0 : index
    %57 = vector.load %arg2[%c2, %c0_19] : memref<16x128xf32, #tpu.memory_space<vmem>>, vector<1x96xf32>
    %58 = vector.broadcast %57 : vector<1x96xf32> to vector<16x96xf32>
    %59 = arith.addf %56, %58 : vector<16x96xf32>
    %60 = arith.truncf %59 : vector<16x96xf32> to vector<16x96xbf16>
    %61 = vector.extract_strided_slice %60 {offsets = [0, 0], sizes = [16, 16], strides = [1, 1]} : vector<16x96xbf16> to vector<16x16xbf16>
    %62 = vector.shape_cast %61 : vector<16x16xbf16> to vector<2x8x16xbf16>
    %63 = vector.extract_strided_slice %60 {offsets = [0, 16], sizes = [16, 16], strides = [1, 1]} : vector<16x96xbf16> to vector<16x16xbf16>
    %64 = vector.shape_cast %63 : vector<16x16xbf16> to vector<2x8x16xbf16>
    %65 = vector.extract_strided_slice %60 {offsets = [0, 32], sizes = [16, 16], strides = [1, 1]} : vector<16x96xbf16> to vector<16x16xbf16>
    %66 = vector.shape_cast %65 : vector<16x16xbf16> to vector<2x8x16xbf16>
    %67 = vector.extract_strided_slice %60 {offsets = [0, 48], sizes = [16, 16], strides = [1, 1]} : vector<16x96xbf16> to vector<16x16xbf16>
    %68 = vector.shape_cast %67 : vector<16x16xbf16> to vector<2x8x16xbf16>
    %69 = vector.extract_strided_slice %60 {offsets = [0, 64], sizes = [16, 16], strides = [1, 1]} : vector<16x96xbf16> to vector<16x16xbf16>
    %70 = vector.shape_cast %69 : vector<16x16xbf16> to vector<2x8x16xbf16>
    %71 = vector.extract_strided_slice %60 {offsets = [0, 80], sizes = [16, 16], strides = [1, 1]} : vector<16x96xbf16> to vector<16x16xbf16>
    %72 = vector.shape_cast %71 : vector<16x16xbf16> to vector<2x8x16xbf16>
    %73 = tpu.concatenate %62, %64, %66, %68, %70, %72 in 0 : vector<2x8x16xbf16>, vector<2x8x16xbf16>, vector<2x8x16xbf16>, vector<2x8x16xbf16>, vector<2x8x16xbf16>, vector<2x8x16xbf16> -> vector<12x8x16xbf16>
    %74 = vector.extract_strided_slice %73 {offsets = [0, 0, 0], sizes = [4, 8, 16], strides = [1, 1, 1]} : vector<12x8x16xbf16> to vector<4x8x16xbf16>
    %75 = vector.extract_strided_slice %73 {offsets = [4, 0, 0], sizes = [4, 8, 16], strides = [1, 1, 1]} : vector<12x8x16xbf16> to vector<4x8x16xbf16>
    %76 = vector.extract_strided_slice %73 {offsets = [8, 0, 0], sizes = [4, 8, 16], strides = [1, 1, 1]} : vector<12x8x16xbf16> to vector<4x8x16xbf16>
    "tpu.trace_start"() <{level = 10 : i32, message = "nqd,nkd->nqk"}> : () -> ()
    %cst_20 = arith.constant dense<0.000000e+00> : vector<4x8x8xf32>
    %77 = tpu.matmul %74, %75, %cst_20 {dimension_numbers = #tpu.dot_dimension_numbers<[2], [2], [1], [1], [0, 0, 0, 1, 1, 1], [0], [0]>} : vector<4x8x16xbf16>, vector<4x8x16xbf16>, vector<4x8x8xf32> -> vector<4x8x8xf32>
    "tpu.trace_stop"() : () -> ()
    %78 = vector.broadcast %53 : vector<4x1x8xf32> to vector<4x8x8xf32>
    %79 = arith.addf %77, %78 : vector<4x8x8xf32>
    %cst_21 = arith.constant dense<0xFF800000> : vector<4x8xf32>
    %80 = vector.multi_reduction <maximumf>, %79, %cst_21 [2] : vector<4x8x8xf32> to vector<4x8xf32>
    %81 = vector.shape_cast %80 : vector<4x8xf32> to vector<4x8x1xf32>
    %82 = vector.broadcast %81 : vector<4x8x1xf32> to vector<4x8x8xf32>
    %83 = arith.subf %79, %82 : vector<4x8x8xf32>
    %84 = math.exp %83 : vector<4x8x8xf32>
    %cst_22 = arith.constant dense<0.000000e+00> : vector<4x8xf32>
    %85 = vector.multi_reduction <add>, %84, %cst_22 [2] : vector<4x8x8xf32> to vector<4x8xf32>
    %86 = vector.shape_cast %85 : vector<4x8xf32> to vector<4x8x1xf32>
    %87 = tpu.reciprocal %86 {approx = true} : vector<4x8x1xf32> -> vector<4x8x1xf32>
    %88 = vector.broadcast %87 : vector<4x8x1xf32> to vector<4x8x8xf32>
    %89 = arith.mulf %84, %88 : vector<4x8x8xf32>
    %90 = arith.truncf %89 : vector<4x8x8xf32> to vector<4x8x8xbf16>
    "tpu.trace_start"() <{level = 10 : i32, message = "nqk,nkd->nqd"}> : () -> ()
    %cst_23 = arith.constant dense<0.000000e+00> : vector<4x8x16xf32>
    %91 = tpu.matmul %90, %76, %cst_23 {dimension_numbers = #tpu.dot_dimension_numbers<[2], [1], [1], [2], [0, 0, 0, 1, 1, 2], [0], [0]>} : vector<4x8x8xbf16>, vector<4x8x16xbf16>, vector<4x8x16xf32> -> vector<4x8x16xf32>
    "tpu.trace_stop"() : () -> ()
    %92 = arith.truncf %91 : vector<4x8x16xf32> to vector<4x8x16xbf16>
    %93 = vector.extract_strided_slice %92 {offsets = [0, 0, 0], sizes = [2, 8, 16], strides = [1, 1, 1]} : vector<4x8x16xbf16> to vector<2x8x16xbf16>
    %94 = vector.shape_cast %93 : vector<2x8x16xbf16> to vector<16x16xbf16>
    %95 = vector.extract_strided_slice %92 {offsets = [2, 0, 0], sizes = [2, 8, 16], strides = [1, 1, 1]} : vector<4x8x16xbf16> to vector<2x8x16xbf16>
    %96 = vector.shape_cast %95 : vector<2x8x16xbf16> to vector<16x16xbf16>
    %97 = tpu.concatenate %94, %96 in 1 : vector<16x16xbf16>, vector<16x16xbf16> -> vector<16x32xbf16>
    %c32 = arith.constant 32 : index
    %c0_24 = arith.constant 0 : index
    %98 = vector.load %arg3[%c32, %c0_24] : memref<224x128xbf16, #tpu.memory_space<vmem>>, vector<32x32xbf16>
    %cst_25 = arith.constant dense<0.000000e+00> : vector<16x32xf32>
    %99 = tpu.matmul %97, %98, %cst_25 {dimension_numbers = #tpu.dot_dimension_numbers<[1], [0], [0], [1], [0, 0, 1, 1], [], []>} : vector<16x32xbf16>, vector<32x32xbf16>, vector<16x32xf32> -> vector<16x32xf32>
    %c3 = arith.constant 3 : index
    %c0_26 = arith.constant 0 : index
    %100 = vector.load %arg2[%c3, %c0_26] : memref<16x128xf32, #tpu.memory_space<vmem>>, vector<1x32xf32>
    %101 = vector.broadcast %100 : vector<1x32xf32> to vector<16x32xf32>
    %102 = arith.addf %99, %101 : vector<16x32xf32>
    %103 = arith.addf %24, %102 : vector<16x32xf32>
    %cst_27 = arith.constant dense<0.000000e+00> : vector<16xf32>
    %104 = vector.multi_reduction <add>, %103, %cst_27 [1] : vector<16x32xf32> to vector<16xf32>
    %105 = vector.shape_cast %104 : vector<16xf32> to vector<16x1xf32>
    %cst_28 = arith.constant 3.200000e+01 : f32
    %106 = vector.broadcast %cst_28 : f32 to vector<16x1xf32>
    %107 = arith.divf %105, %106 : vector<16x1xf32>
    %108 = vector.broadcast %107 : vector<16x1xf32> to vector<16x32xf32>
    %109 = arith.subf %103, %108 : vector<16x32xf32>
    %110 = arith.mulf %109, %109 : vector<16x32xf32>
    %cst_29 = arith.constant dense<0.000000e+00> : vector<16xf32>
    %111 = vector.multi_reduction <add>, %110, %cst_29 [1] : vector<16x32xf32> to vector<16xf32>
    %112 = vector.shape_cast %111 : vector<16xf32> to vector<16x1xf32>
    %cst_30 = arith.constant 3.200000e+01 : f32
    %113 = vector.broadcast %cst_30 : f32 to vector<16x1xf32>
    %114 = arith.divf %112, %113 : vector<16x1xf32>
    %115 = vector.broadcast %107 : vector<16x1xf32> to vector<16x32xf32>
    %116 = arith.subf %103, %115 : vector<16x32xf32>
    %cst_31 = arith.constant 9.99999996E-13 : f32
    %117 = vector.broadcast %cst_31 : f32 to vector<16x1xf32>
    %118 = arith.addf %114, %117 : vector<16x1xf32>
    %119 = math.rsqrt %118 : vector<16x1xf32>
    %120 = vector.broadcast %119 : vector<16x1xf32> to vector<16x32xf32>
    %121 = arith.mulf %116, %120 : vector<16x32xf32>
    %c4 = arith.constant 4 : index
    %c0_32 = arith.constant 0 : index
    %122 = vector.load %arg2[%c4, %c0_32] : memref<16x128xf32, #tpu.memory_space<vmem>>, vector<1x32xf32>
    %123 = vector.broadcast %122 : vector<1x32xf32> to vector<16x32xf32>
    %124 = arith.mulf %121, %123 : vector<16x32xf32>
    %c5 = arith.constant 5 : index
    %c0_33 = arith.constant 0 : index
    %125 = vector.load %arg2[%c5, %c0_33] : memref<16x128xf32, #tpu.memory_space<vmem>>, vector<1x32xf32>
    %126 = vector.broadcast %125 : vector<1x32xf32> to vector<16x32xf32>
    %127 = arith.addf %124, %126 : vector<16x32xf32>
    %128 = arith.truncf %127 : vector<16x32xf32> to vector<16x32xbf16>
    %c64 = arith.constant 64 : index
    %c0_34 = arith.constant 0 : index
    %129 = vector.load %arg3[%c64, %c0_34] : memref<224x128xbf16, #tpu.memory_space<vmem>>, vector<32x64xbf16>
    %cst_35 = arith.constant dense<0.000000e+00> : vector<16x64xf32>
    %130 = tpu.matmul %128, %129, %cst_35 {dimension_numbers = #tpu.dot_dimension_numbers<[1], [0], [0], [1], [0, 0, 1, 1], [], []>} : vector<16x32xbf16>, vector<32x64xbf16>, vector<16x64xf32> -> vector<16x64xf32>
    %c6 = arith.constant 6 : index
    %c0_36 = arith.constant 0 : index
    %131 = vector.load %arg2[%c6, %c0_36] : memref<16x128xf32, #tpu.memory_space<vmem>>, vector<1x64xf32>
    %132 = vector.broadcast %131 : vector<1x64xf32> to vector<16x64xf32>
    %133 = arith.addf %130, %132 : vector<16x64xf32>
    %134 = arith.mulf %133, %133 : vector<16x64xf32>
    %135 = arith.mulf %133, %134 : vector<16x64xf32>
    %cst_37 = arith.constant 4.471500e-02 : f32
    %136 = vector.broadcast %cst_37 : f32 to vector<16x64xf32>
    %137 = arith.mulf %136, %135 : vector<16x64xf32>
    %138 = arith.addf %133, %137 : vector<16x64xf32>
    %cst_38 = arith.constant 0.797884583 : f32
    %139 = vector.broadcast %cst_38 : f32 to vector<16x64xf32>
    %140 = arith.mulf %139, %138 : vector<16x64xf32>
    %141 = math.tanh %140 : vector<16x64xf32>
    %cst_39 = arith.constant 1.000000e+00 : f32
    %142 = vector.broadcast %cst_39 : f32 to vector<16x64xf32>
    %143 = arith.addf %142, %141 : vector<16x64xf32>
    %cst_40 = arith.constant 5.000000e-01 : f32
    %144 = vector.broadcast %cst_40 : f32 to vector<16x64xf32>
    %145 = arith.mulf %144, %143 : vector<16x64xf32>
    %146 = arith.mulf %133, %145 : vector<16x64xf32>
    %147 = arith.truncf %146 : vector<16x64xf32> to vector<16x64xbf16>
    %c96 = arith.constant 96 : index
    %c0_41 = arith.constant 0 : index
    %148 = vector.load %arg3[%c96, %c0_41] : memref<224x128xbf16, #tpu.memory_space<vmem>>, vector<64x32xbf16>
    %cst_42 = arith.constant dense<0.000000e+00> : vector<16x32xf32>
    %149 = tpu.matmul %147, %148, %cst_42 {dimension_numbers = #tpu.dot_dimension_numbers<[1], [0], [0], [1], [0, 0, 1, 1], [], []>} : vector<16x64xbf16>, vector<64x32xbf16>, vector<16x32xf32> -> vector<16x32xf32>
    %c7 = arith.constant 7 : index
    %c0_43 = arith.constant 0 : index
    %150 = vector.load %arg2[%c7, %c0_43] : memref<16x128xf32, #tpu.memory_space<vmem>>, vector<1x32xf32>
    %151 = vector.broadcast %150 : vector<1x32xf32> to vector<16x32xf32>
    %152 = arith.addf %149, %151 : vector<16x32xf32>
    %153 = arith.addf %127, %152 : vector<16x32xf32>
    %cst_44 = arith.constant dense<0.000000e+00> : vector<16xf32>
    %154 = vector.multi_reduction <add>, %153, %cst_44 [1] : vector<16x32xf32> to vector<16xf32>
    %155 = vector.shape_cast %154 : vector<16xf32> to vector<16x1xf32>
    %cst_45 = arith.constant 3.200000e+01 : f32
    %156 = vector.broadcast %cst_45 : f32 to vector<16x1xf32>
    %157 = arith.divf %155, %156 : vector<16x1xf32>
    %158 = vector.broadcast %157 : vector<16x1xf32> to vector<16x32xf32>
    %159 = arith.subf %153, %158 : vector<16x32xf32>
    %160 = arith.mulf %159, %159 : vector<16x32xf32>
    %cst_46 = arith.constant dense<0.000000e+00> : vector<16xf32>
    %161 = vector.multi_reduction <add>, %160, %cst_46 [1] : vector<16x32xf32> to vector<16xf32>
    %162 = vector.shape_cast %161 : vector<16xf32> to vector<16x1xf32>
    %cst_47 = arith.constant 3.200000e+01 : f32
    %163 = vector.broadcast %cst_47 : f32 to vector<16x1xf32>
    %164 = arith.divf %162, %163 : vector<16x1xf32>
    %165 = vector.broadcast %157 : vector<16x1xf32> to vector<16x32xf32>
    %166 = arith.subf %153, %165 : vector<16x32xf32>
    %cst_48 = arith.constant 9.99999996E-13 : f32
    %167 = vector.broadcast %cst_48 : f32 to vector<16x1xf32>
    %168 = arith.addf %164, %167 : vector<16x1xf32>
    %169 = math.rsqrt %168 : vector<16x1xf32>
    %170 = vector.broadcast %169 : vector<16x1xf32> to vector<16x32xf32>
    %171 = arith.mulf %166, %170 : vector<16x32xf32>
    %c8 = arith.constant 8 : index
    %c0_49 = arith.constant 0 : index
    %172 = vector.load %arg2[%c8, %c0_49] : memref<16x128xf32, #tpu.memory_space<vmem>>, vector<1x32xf32>
    %173 = vector.broadcast %172 : vector<1x32xf32> to vector<16x32xf32>
    %174 = arith.mulf %171, %173 : vector<16x32xf32>
    %c9 = arith.constant 9 : index
    %c0_50 = arith.constant 0 : index
    %175 = vector.load %arg2[%c9, %c0_50] : memref<16x128xf32, #tpu.memory_space<vmem>>, vector<1x32xf32>
    %176 = vector.broadcast %175 : vector<1x32xf32> to vector<16x32xf32>
    %177 = arith.addf %174, %176 : vector<16x32xf32>
    %c0_51 = arith.constant 0 : index
    %c0_52 = arith.constant 0 : index
    %178 = vector.load %arg5[%c0_51, %c0_52] : memref<16x32xf32, #tpu.memory_space<vmem>>, vector<16x32xf32>
    tpu.vector_store %arg5[%c0_51, %c0_52], %177 {strides = array<i32>} : memref<16x32xf32, #tpu.memory_space<vmem>>, vector<16x32xf32>,
    %c0_53 = arith.constant 0 : index
    %c0_54 = arith.constant 0 : index
    %179 = tpu.strided_load %arg5[%c0_53, %c0_54] {strides = array<i32: 8, 1>} : memref<16x32xf32, #tpu.memory_space<vmem>>, vector<2x32xf32>
    %180 = arith.truncf %179 : vector<2x32xf32> to vector<2x32xbf16>
    %c160 = arith.constant 160 : index
    %c0_55 = arith.constant 0 : index
    %181 = vector.load %arg3[%c160, %c0_55] : memref<224x128xbf16, #tpu.memory_space<vmem>>, vector<32x32xbf16>
    %cst_56 = arith.constant dense<0.000000e+00> : vector<2x32xf32>
    %182 = tpu.matmul %180, %181, %cst_56 {dimension_numbers = #tpu.dot_dimension_numbers<[1], [0], [0], [1], [0, 0, 1, 1], [], []>} : vector<2x32xbf16>, vector<32x32xbf16>, vector<2x32xf32> -> vector<2x32xf32>
    %c10 = arith.constant 10 : index
    %c0_57 = arith.constant 0 : index
    %183 = vector.load %arg2[%c10, %c0_57] : memref<16x128xf32, #tpu.memory_space<vmem>>, vector<1x32xf32>
    %184 = vector.broadcast %183 : vector<1x32xf32> to vector<2x32xf32>
    %185 = arith.addf %182, %184 : vector<2x32xf32>
    %186 = math.tanh %185 : vector<2x32xf32>
    %187 = arith.truncf %186 : vector<2x32xf32> to vector<2x32xbf16>
    %c192 = arith.constant 192 : index
    %c0_58 = arith.constant 0 : index
    %188 = vector.load %arg3[%c192, %c0_58] : memref<224x128xbf16, #tpu.memory_space<vmem>>, vector<32x128xbf16>
    %cst_59 = arith.constant dense<0.000000e+00> : vector<2x128xf32>
    %189 = tpu.matmul %187, %188, %cst_59 {dimension_numbers = #tpu.dot_dimension_numbers<[1], [0], [0], [1], [0, 0, 1, 1], [], []>} : vector<2x32xbf16>, vector<32x128xbf16>, vector<2x128xf32> -> vector<2x128xf32>
    %c11 = arith.constant 11 : index
    %c0_60 = arith.constant 0 : index
    %190 = vector.load %arg2[%c11, %c0_60] : memref<16x128xf32, #tpu.memory_space<vmem>>, vector<1x128xf32>
    %191 = vector.broadcast %190 : vector<1x128xf32> to vector<2x128xf32>
    %192 = arith.addf %189, %191 : vector<2x128xf32>
    %c0_61 = arith.constant 0 : index
    %c0_62 = arith.constant 0 : index
    %193 = vector.load %arg4[%c0_61, %c0_62] : memref<2x128xf32, #tpu.memory_space<vmem>>, vector<2x128xf32>
    tpu.vector_store %arg4[%c0_61, %c0_62], %192 {strides = array<i32>} : memref<2x128xf32, #tpu.memory_space<vmem>>, vector<2x128xf32>,
    return
  }
}

</mosaic_0001>

<bundles_post_ra>
// kernel: tpu_custom_call.1
= control target key start
LH: loop header
LB: loop body
LE: loop exit
PB: predicated region body
PF: predicated region fallthrough
CT: control target
= control target key end

     0   :  { %9 = vsyncpa [#allocation6], 0  ;;  %s1647_s0 = inlined_call_operand.hbm [shape: s32[2], index: 0, kind: input, shape index: {}]   ;;  %s1648_s1 = inlined_call_operand.hbm [shape: f32[16,32], index: 1, kind: input, shape index: {}]   ;;  %s1649_s2 = inlined_call_operand.hbm [shape: f32[16,128], index: 2, kind: input, shape index: {}]   ;;  %s1650_s3 = inlined_call_operand.hbm [shape: bf16[224,128], index: 3, kind: input, shape index: {}]   ;;  %s1651_s4 = inlined_call_operand.hbm [shape: f32[2,128], index: 4, kind: output, shape index: {}]  }
   0x1   :  { %10 = vsyncpa [#allocation4], 0 }
   0x2   :  { %11 = vsyncpa [#allocation9], 0 }
   0x3   :  { %12 = vsyncpa [#allocation5], 0  ;;  %s1468_s15 = smov [#allocation8]   ;;  %s1469_s17 = smov [#allocation7]  }
   0x4   :  { %s38_s16 = sshll.u32 %s1468_s15, 4  ;;  %s26_s18 = sshll.u32 %s1469_s17, 4  ;;  %s39_s16 = int_to_ptr.vmem [resolvable:$true] %s38_s16  ;;  %s27_s18 = int_to_ptr.vmem [resolvable:$true] %s26_s18 }
   0x5   :  { %s1380_s19 = scalar_lea.vmem %s39_s16, 256  ;;  %p1385_p1 = scmp.lt.s32.totalorder %s39_s16, %s39_s16 }
   0x6   :  { %p1381_p0 = scmp.ne.s32.totalorder %s39_s16, %s1380_s19  ;;  %p1386_p2 = scmp.lt.s32.totalorder %s1380_s19, %s1380_s19 }
   0x8   :  { %p1387_p3 = por %p1386_p2, %p1385_p1 }
   0xa   :  { %p1388_p4 = pnand %p1387_p3, %p1381_p0 }
   0xc   :  { %1391 = shalt.err (!%p1388_p4)
}
   0xd   :  { %s1470_s20 = smov 128   ;;  %s1471_s21 = smov 8  }
   0xe   :  { %44 = dma.hbm_to_vmem [thread:$0]  %s1649_s2, 256, %s39_s16, [#allocation9], %s1470_s20, %s1470_s20, %s1471_s21  }
   0xf   :  { %s1472_s24 = smov [#allocation3]   ;;  %s1408_s27 = scalar_lea.vmem %s27_s18, 256 }
  0x10   :  { %20 = dma.hbm_to_smem %s1647_s0, 16, %s1472_s24, [#allocation6]  }
  0x11   :  { %p1409_p5 = scmp.ne.s32.totalorder %s27_s18, %s1408_s27  ;;  %p1413_p6 = scmp.lt.s32.totalorder %s27_s18, %s27_s18 }
  0x12   :  { %p1414_p7 = scmp.lt.s32.totalorder %s1408_s27, %s1408_s27 }
  0x14   :  { %p1415_p8 = por %p1414_p7, %p1413_p6 }
  0x16   :  { %p1416_p9 = pnand %p1415_p8, %p1409_p5 }
  0x18   :  { %1419 = shalt.err (!%p1416_p9)
}
  0x19   :  { %32 = dma.hbm_to_vmem [thread:$0]  %s1648_s1, 256, %s27_s18, [#allocation4], %s1470_s20, %s1470_s20, %s1471_s21  }
  0x1a   :  { %s1473_s30 = smov [#allocation10]  }
  0x1b   :  { %s50_s5 = sshll.u32 %s1473_s30, 4  ;;  %s51_s5 = int_to_ptr.vmem [resolvable:$true] %s50_s5 }
  0x1c   :  { %s1428_s2 = scalar_lea.vmem %s51_s5, 1792  ;;  %p1433_p11 = scmp.lt.s32.totalorder %s51_s5, %s51_s5 }
  0x1d   :  { %p1429_p10 = scmp.ne.s32.totalorder %s51_s5, %s1428_s2  ;;  %p1434_p12 = scmp.lt.s32.totalorder %s1428_s2, %s1428_s2 }
  0x1f   :  { %p1435_p13 = por %p1434_p12, %p1433_p11 }
  0x21   :  { %p1436_p0 = pnand %p1435_p13, %p1429_p10 }
  0x23   :  { %1439 = shalt.err (!%p1436_p0)
}
  0x24   :  { %s1474_s0 = smov 64   ;;  %s1475_s6 = smov 4  }
  0x25   :  { %56 = dma.hbm_to_vmem [thread:$0]  %s1650_s3, 1792, %s51_s5, [#allocation9], %s1474_s0, %s1474_s0, %s1475_s6  }
  0x26   :  { %1460 = dma.done.wait [#allocation6], 16  }
  0x27   :  { %1461 = vsyncadd [#allocation6], 4294967280 }
  0x28   :  { %1462 = dma.done.wait [#allocation4], 256  }
  0x29   :  { %1463 = vsyncadd [#allocation4], 4294967040 }
  0x2a   :  { %1464 = dma.done.wait [#allocation9], 2048  }
  0x2b   :  { %1465 = vsyncadd [#allocation9], 4294965248 }
  0x2c   :  { %69 = sfence }
  0x2d   :  { %v71_v0 = vld [vmem:[#allocation7] sm:$0xff]  ;;  %vm73_vm0 = vcmask 261120   ;;  %v72_v1 = vld [vmem:[#allocation7 + $0x8] sm:$0xff]  ;;  %v1476_v15 = vmov 0.0   ;;  %vm1477_vm1 = vmmov 0   ;;  %s1478_s1 = smov 96   ;;  %v115_v53 = vlaneseq }
  0x2e   :  { %v74_v2 = vsel %vm73_vm0, %v71_v0, 0.0  ;;  %v77_v3 = vsel %vm73_vm0, %v72_v1, 0.0  ;;  %v1324_v14 = vld [vmem:[#allocation10 + $0x8] sm:$0xff]   ;;  %1207 = vmatprep.subr.bf16.mxu0 %v1476_v15  ;;  %1211 = vmatprep.mubr.msk.bf16.mxu0 %vm1477_vm1, %v1476_v15  ;;  %v1325_v16 = vld [vmem:[#allocation10] sm:$0xff]   ;;  %v1122_v25 = vld [vmem:[#allocation8] ss:$0 sm:$0xff] }
  0x2f   :  { %75 = vadd.xlane.f32.xlu0 %v74_v2  ;;  %1208 = vmatpush3.bf16.msra.mxu0 %v1324_v14  ;;  %v1123_v29 = vld [vmem:[#allocation8 + $0x1] ss:$0 sm:$0xff]  ;;  %v1125_v34 = vld [vmem:[#allocation8 + $0x2] ss:$0 sm:$0xff]  ;;  %s1479_s3 = smov 112   ;;  %s1480_s9 = smov 80  }
  0x30   :  { %1215 = vmatprep.subr.bf16.mxu1 %v1476_v15  ;;  %1209 = vmatprep.subr.bf16.mxu0 %v1476_v15  ;;  %vm217_vm2 = vcmask 130048   ;;  %s117_s10 = sld [smem:[#allocation3]]  ;;  %v116_v54 = vand.u32 127, %v115_v53  ;;  %v1481_v57 = vmov -10000.0   ;;  %vm402_vm5 = vcmask 64512   ;;  %s1482_s12 = smov 48  }
  0x31   :  { %1217 = vmatprep.mubr.msk.bf16.mxu1 %vm1477_vm1, %v1476_v15  ;;  %s1124_s11 = sld [smem:[#allocation3 + $0x1]]  ;;  %vm454_vm6 = vcmask 1043456   ;;  %s1483_s13 = smov 16   ;;  %vm883_vm7 = vcmask 523264  }
  0x32   :  { %s1484_s14 = smov [#allocation11]  }
  0x33   :  { %78 = vadd.xlane.f32.xlu0 %v77_v3  ;;  %1210 = vmatpush3.bf16.msra.mxu0 %v1325_v16  ;;  %s1111_s15 = sshll.u32 %s1484_s14, 4  ;;  %s1112_s15 = int_to_ptr.vmem [resolvable:$true] %s1111_s15 }
  0x34   :  { %1221 = vmatprep.subr.bf16.mxu0 %v1476_v15  ;;  %s1440_s16 = scalar_lea.vmem %s1112_s15, 32  ;;  %p1445_p2 = scmp.lt.s32.totalorder %s1112_s15, %s1112_s15 }
  0x35   :  { %p1441_p1 = scmp.ne.s32.totalorder %s1112_s15, %s1440_s16  ;;  %p1446_p3 = scmp.lt.s32.totalorder %s1440_s16, %s1440_s16 }
  0x36   :  { %v118_v55 = vstv %s117_s10 }
  0x37   :  { %vm121_vm3 = vcmp.lt.s32.totalorder %v116_v54, %v118_v55  ;;  %v120_v56 = vstv %s1124_s11  ;;  %p1447_p4 = por %p1446_p3, %p1445_p2 }
  0x38   :  { %v123_v58 = vsel %vm121_vm3, 0.0, %v1481_v57  ;;  %vm122_vm4 = vcmp.lt.s32.totalorder %v116_v54, %v120_v56 }
  0x39   :  { %v124_v62 = vsel %vm122_vm4, 0.0, %v1481_v57  ;;  %p1448_p5 = pnand %p1447_p4, %p1441_p1 }
  0xb8   :  { %v76_v4 = vpop.xlane.xlu0 %75 }
  0xb9   :  { %v81_v5 = vmul.f32 0.03125, %v76_v4 }
  0xbb   :  { %v83_v6 = vsub.f32 %v71_v0, %v81_v5 }
  0xbc   :  { %v79_v7 = vpop.xlane.xlu0 %78 }
  0xbd   :  { %v82_v8 = vmul.f32 0.03125, %v79_v7  ;;  %v85_v9 = vmul.f32 %v83_v6, %v83_v6 }
  0xbf   :  { %v84_v10 = vsub.f32 %v72_v1, %v82_v8  ;;  %v87_v11 = vsel %vm73_vm0, %v85_v9, 0.0 }
  0xc0   :  { %88 = vadd.xlane.f32.xlu1 %v87_v11 }
  0xc1   :  { %v86_v12 = vmul.f32 %v84_v10, %v84_v10 }
  0xc3   :  { %v90_v13 = vsel %vm73_vm0, %v86_v12, 0.0 }
  0xc4   :  { %91 = vadd.xlane.f32.xlu1 %v90_v13 }
 0x149   :  { %v89_v17 = vpop.xlane.xlu1 %88 }
 0x14a   :  { %v93_v18 = vmul.f32 0.03125, %v89_v17 }
 0x14c   :  { %v95_v19 = vadd.f32 1e-12, %v93_v18 }
 0x14d   :  { %v92_v20 = vpop.xlane.xlu1 %91 }
 0x14e   :  { %1338 = vrsqrt.f32 %v95_v19  ;;  %v94_v21 = vmul.f32 0.03125, %v92_v20 }
 0x150   :  { %v96_v22 = vadd.f32 1e-12, %v94_v21 }
 0x152   :  { %1340 = vrsqrt.f32 %v96_v22 }
 0x15b   :  { %v1339_v23 = vpop.eup %1338 }
 0x15c   :  { %v99_v24 = vmul.f32 %v1339_v23, %v83_v6 }
 0x15e   :  { %v106_v28 = vmul.f32 %v1122_v25, %v99_v24 }
 0x15f   :  { %v1341_v26 = vpop.eup %1340 }
 0x160   :  { %v100_v27 = vmul.f32 %v1341_v26, %v84_v10  ;;  %v1536_v31 = vadd.f32 %v1123_v29, %v106_v28 }
 0x162   :  { %v107_v30 = vmul.f32 %v1122_v25, %v100_v27 }
 0x164   :  { %v1538_v32 = vadd.f32 %v1123_v29, %v107_v30 }
 0x166   :  { %v125_v33 = vpack.c.bf16 %v1538_v32, %v1536_v31 }
 0x168   :  { %1212 = vmatmul.mubr.msk.bf16.vlgmr.msra.gmra.mxu0 %vm73_vm0, %v125_v33 }
 0x169   :  { %1223 = vmatprep.mubr.msk.bf16.mxu0 %vm1477_vm1, %v1476_v15 }
 0x228   :  { %v184_v35 = vpop.f32.mrf.mxu0 }
 0x229   :  { %v185_v36 = vadd.f32 %v1125_v34, %v184_v35 }
 0x22a   :  { %v1213_v37 = vpop.f32.mrf.mxu0 }
 0x22b   :  { %v1545_v38 = vpack.c.bf16 %v185_v36, %v185_v36 }
 0x22c   :  { %v187_v39 = vpop.f32.mrf.mxu0 }
 0x22d   :  { %v188_v40 = vadd.f32 %v1125_v34, %v187_v39  ;;  %201 = vrot.lane.b32.xlu0 %v1545_v38, %s1478_s1 }
 0x22e   :  { %v1214_v41 = vpop.f32.mrf.mxu0 }
 0x22f   :  { %v1548_v42 = vpack.c.bf16 %v188_v40, %v188_v40 }
 0x231   :  { %197 = vrot.lane.b32.xlu0 %v1545_v38, %s1479_s3  ;;  %203 = vrot.lane.b32.xlu1 %v1548_v42, %s1478_s1 }
 0x235   :  { %205 = vrot.lane.b32.xlu1 %v1545_v38, %s1480_s9 }
 0x239   :  { %207 = vrot.lane.b32.xlu1 %v1548_v42, %s1480_s9 }
 0x23d   :  { %199 = vrot.lane.b32.xlu1 %v1548_v42, %s1479_s3 }
 0x29f   :  { %v202_v43 = vpop.permute.xlu0 %201 }
 0x2a0   :  { %v222_v44 = vsel %vm217_vm2, %v202_v43, 0 }
 0x2a1   :  { %1216 = vmatpush3.bf16.xpose.msra.mxu1 %v222_v44 }
 0x2a2   :  { %1227 = vmatprep.subr.bf16.mxu1 %v1476_v15 }
 0x2a3   :  { %v204_v45 = vpop.permute.xlu1 %203  ;;  %v198_v51 = vpop.permute.xlu0 %197 }
 0x2a4   :  { %v268_v46 = vsel %vm217_vm2, %v204_v45, 0 }
 0x2a5   :  { %1222 = vmatpush3.bf16.xpose.msra.mxu0 %v268_v46 }
 0x2a6   :  { %1233 = vmatprep.subr.bf16.mxu0 %v1476_v15 }
 0x2a7   :  { %v206_v47 = vpop.permute.xlu1 %205 }
 0x2a8   :  { %v314_v48 = vsel %vm217_vm2, %v206_v47, 0  ;;  %1218 = vmatmul.mubr.msk.bf16.vlgmr.msra.gmra.mxu1 %vm217_vm2, %v1545_v38 }
 0x2a9   :  { %1228 = vmatpush3.bf16.xpose.msra.mxu1 %v314_v48  ;;  %1229 = vmatprep.mubr.msk.bf16.mxu1 %vm1477_vm1, %v1476_v15 }
 0x2aa   :  { %1239 = vmatprep.subr.bf16.mxu1 %v1476_v15 }
 0x2ab   :  { %v208_v49 = vpop.permute.xlu1 %207 }
 0x2ac   :  { %v360_v50 = vsel %vm217_vm2, %v208_v49, 0  ;;  %1224 = vmatmul.mubr.msk.bf16.vlgmr.msra.gmra.mxu0 %vm217_vm2, %v1548_v42 }
 0x2ad   :  { %1234 = vmatpush3.bf16.xpose.msra.mxu0 %v360_v50  ;;  %1235 = vmatprep.mubr.msk.bf16.mxu0 %vm1477_vm1, %v1476_v15 }
 0x2ae   :  { %1245 = vmatprep.subr.bf16.mxu0 %v1476_v15 }
 0x2af   :  { %v200_v52 = vpop.permute.xlu1 %199 }
 0x2b0   :  { %1230 = vmatmul.mubr.msk.bf16.vlgmr.msra.gmra.mxu1 %vm217_vm2, %v198_v51 }
 0x2b1   :  { %1241 = vmatprep.mubr.msk.bf16.mxu1 %vm1477_vm1, %v1476_v15 }
 0x2b4   :  { %1236 = vmatmul.mubr.msk.bf16.vlgmr.msra.gmra.mxu0 %vm217_vm2, %v200_v52 }
 0x2b5   :  { %1247 = vmatprep.mubr.msk.bf16.mxu0 %vm1477_vm1, %v1476_v15 }
 0x368   :  { %v258_v59 = vpop.f32.mrf.mxu1 }
 0x369   :  { %v259_v60 = vadd.f32 %v258_v59, %v123_v58 }
 0x36a   :  { %v1219_v61 = vpop.f32.mrf.mxu1 }
 0x36b   :  { %v403_v63 = vsel %vm402_vm5, %v259_v60, -inf }
 0x36c   :  { %404 = vmax.xlane.f32.xlu0 %v403_v63  ;;  %v261_v0 = vpop.f32.mrf.mxu1  ;;  %v304_v1 = vpop.f32.mrf.mxu0 }
 0x36d   :  { %v305_v2 = vadd.f32 %v304_v1, %v124_v62 }
 0x36e   :  { %v1220_v3 = vpop.f32.mrf.mxu1  ;;  %v1225_v4 = vpop.f32.mrf.mxu0 }
 0x36f   :  { %v406_v5 = vsel %vm402_vm5, %v305_v2, -inf  ;;  %v1326_v3 = vld [vmem:[#allocation10 + $0x18] sm:$0xff]   ;;  %v1327_v4 = vld [vmem:[#allocation10 + $0x10] sm:$0xff]  }
 0x370   :  { %v350_v6 = vpop.f32.mrf.mxu1  ;;  %407 = vmax.xlane.f32.xlu1 %v406_v5  ;;  %v307_v7 = vpop.f32.mrf.mxu0 }
 0x371   :  { %v351_v8 = vadd.f32 %v350_v6, %v123_v58 }
 0x372   :  { %v1226_v9 = vpop.f32.mrf.mxu0  ;;  %v1231_v10 = vpop.f32.mrf.mxu1 }
 0x373   :  { %v409_v11 = vsel %vm402_vm5, %v351_v8, -inf }
 0x374   :  { %410 = vmax.xlane.f32.xlu0 %v409_v11  ;;  %v353_v12 = vpop.f32.mrf.mxu1  ;;  %v396_v13 = vpop.f32.mrf.mxu0 }
 0x375   :  { %v397_v14 = vadd.f32 %v396_v13, %v124_v62 }
 0x376   :  { %v1232_v16 = vpop.f32.mrf.mxu1  ;;  %v1237_v17 = vpop.f32.mrf.mxu0 }
 0x377   :  { %v412_v18 = vsel %vm402_vm5, %v397_v14, -inf }
 0x378   :  { %413 = vmax.xlane.f32.xlu0 %v412_v18  ;;  %v399_v19 = vpop.f32.mrf.mxu0 }
 0x37a   :  { %v1238_v20 = vpop.f32.mrf.mxu0 }
 0x3f5   :  { %v405_v21 = vpop.xlane.xlu0 %404 }
 0x3f6   :  { %v415_v22 = vsub.f32 %v259_v60, %v405_v21 }
 0x3f8   :  { %v419_v23 = vmul.f32 1.442695, %v415_v22 }
 0x3f9   :  { %v408_v24 = vpop.xlane.xlu1 %407 }
 0x3fa   :  { %1342 = vpow2.f32 %v419_v23  ;;  %v416_v25 = vsub.f32 %v305_v2, %v408_v24 }
 0x3fc   :  { %v421_v26 = vmul.f32 1.442695, %v416_v25 }
 0x3fd   :  { %v411_v27 = vpop.xlane.xlu0 %410 }
 0x3fe   :  { %1344 = vpow2.f32 %v421_v26  ;;  %v417_v28 = vsub.f32 %v351_v8, %v411_v27  ;;  %v1141_v26 = vld [vmem:[#allocation8 + $0x3] ss:$0 sm:$0xff] }
 0x400   :  { %v423_v29 = vmul.f32 1.442695, %v417_v28 }
 0x401   :  { %v414_v39 = vpop.xlane.xlu0 %413 }
 0x402   :  { %1346 = vpow2.f32 %v423_v29  ;;  %v418_v40 = vsub.f32 %v397_v14, %v414_v39 }
 0x404   :  { %v425_v41 = vmul.f32 1.442695, %v418_v40 }
 0x406   :  { %1348 = vpow2.f32 %v425_v41 }
 0x407   :  { %v1343_v30 = vpop.eup %1342 }
 0x408   :  { %v427_v33 = vsel %vm402_vm5, %v1343_v30, 0.0 }
 0x409   :  { %428 = vadd.xlane.f32.xlu0 %v427_v33 }
 0x40b   :  { %v1345_v34 = vpop.eup %1344 }
 0x40c   :  { %v430_v35 = vsel %vm402_vm5, %v1345_v34, 0.0 }
 0x40d   :  { %431 = vadd.xlane.f32.xlu1 %v430_v35 }
 0x40f   :  { %v1347_v36 = vpop.eup %1346 }
 0x410   :  { %v433_v37 = vsel %vm402_vm5, %v1347_v36, 0.0 }
 0x411   :  { %434 = vadd.xlane.f32.xlu0 %v433_v37 }
 0x413   :  { %v1349_v43 = vpop.eup %1348 }
 0x414   :  { %v436_v44 = vsel %vm402_vm5, %v1349_v43, 0.0 }
 0x41e   :  { %211 = vrot.lane.b32.xlu1 %v1548_v42, %s1474_s0 }
 0x422   :  { %213 = vrot.lane.b32.xlu1 %v1545_v38, %s1482_s12 }
 0x427   :  { %209 = vrot.lane.b32.xlu0 %v1545_v38, %s1474_s0 }
 0x446   :  { %437 = vadd.xlane.f32.xlu1 %v436_v44 }
 0x457   :  { %215 = vrot.lane.b32.xlu1 %v1548_v42, %s1482_s12 }
 0x492   :  { %v429_v45 = vpop.xlane.xlu0 %428 }
 0x493   :  { %1350 = vrcp.f32 %v429_v45 }
 0x496   :  { %v432_v46 = vpop.xlane.xlu1 %431 }
 0x497   :  { %1352 = vrcp.f32 %v432_v46 }
 0x49a   :  { %v212_v47 = vpop.permute.xlu1 %211  ;;  %v435_v48 = vpop.xlane.xlu0 %434 }
 0x49b   :  { %v502_v49 = vsel %vm454_vm6, %v212_v47, 0  ;;  %1354 = vrcp.f32 %v435_v48 }
 0x49c   :  { %1246 = vmatpush3.bf16.msra.mxu0 %v502_v49 }
 0x49d   :  { %1257 = vmatprep.subr.bf16.mxu0 %v1476_v15 }
 0x49e   :  { %v210_v38 = vpop.permute.xlu0 %209  ;;  %v214_v52 = vpop.permute.xlu1 %213 }
 0x49f   :  { %v456_v50 = vsel %vm454_vm6, %v210_v38, 0  ;;  %v548_v55 = vsel %vm454_vm6, %v214_v52, 0  ;;  %v1328_v38 = vld [vmem:[#allocation10 + $0x28] sm:$0xff]  }
 0x4a0   :  { %v1351_v51 = vpop.eup %1350  ;;  %1240 = vmatpush3.bf16.msra.mxu1 %v456_v50 }
 0x4a1   :  { %1251 = vmatprep.subr.bf16.mxu1 %v1476_v15  ;;  %v443_v42 = vmul.f32 %v1351_v51, %v1343_v30 }
 0x4a3   :  { %v447_v53 = vpack.c.bf16 %v443_v42, %v443_v42 }
 0x4a4   :  { %v1353_v54 = vpop.eup %1352 }
 0x4a5   :  { %1242 = vmatmul.mubr.msk.bf16.vlgmr.msra.gmra.mxu1 %vm402_vm5, %v447_v53  ;;  %v444_v56 = vmul.f32 %v1353_v54, %v1345_v34 }
 0x4a6   :  { %1252 = vmatpush3.bf16.msra.mxu1 %v548_v55  ;;  %1253 = vmatprep.mubr.msk.bf16.mxu1 %vm1477_vm1, %v1476_v15 }
 0x4a7   :  { %v448_v57 = vpack.c.bf16 %v444_v56, %v444_v56  ;;  %1263 = vmatprep.subr.bf16.mxu1 %v1476_v15 }
 0x4a8   :  { %v1355_v58 = vpop.eup %1354 }
 0x4a9   :  { %1248 = vmatmul.mubr.msk.bf16.vlgmr.msra.gmra.mxu0 %vm402_vm5, %v448_v57  ;;  %v445_v59 = vmul.f32 %v1355_v58, %v1347_v36  ;;  %v1145_v57 = vld [vmem:[#allocation8 + $0x4] ss:$0 sm:$0xff] }
 0x4aa   :  { %1259 = vmatprep.mubr.msk.bf16.mxu0 %vm1477_vm1, %v1476_v15 }
 0x4ab   :  { %v449_v60 = vpack.c.bf16 %v445_v59, %v445_v59 }
 0x4ad   :  { %1254 = vmatmul.mubr.msk.bf16.vlgmr.msra.gmra.mxu1 %vm402_vm5, %v449_v60 }
 0x4ae   :  { %1267 = vmatprep.mubr.msk.bf16.mxu1 %vm1477_vm1, %v1476_v15  ;;  %1264 = vmatpush3.bf16.msra.mxu1 %v1326_v3  ;;  %v1331_v3 = vld [vmem:[#allocation10 + $0x40] sm:$0xff]  }
 0x4af   :  { %1265 = vmatprep.subr.bf16.mxu1 %v1476_v15 }
 0x4b2   :  { %1266 = vmatpush3.bf16.msra.mxu1 %v1327_v4  ;;  %v1332_v4 = vld [vmem:[#allocation10 + $0x38] sm:$0xff]  }
 0x4b3   :  { %1279 = vmatprep.subr.bf16.mxu1 %v1476_v15 }
 0x4cf   :  { %v438_v61 = vpop.xlane.xlu1 %437 }
 0x4d0   :  { %1356 = vrcp.f32 %v438_v61  ;;  %v1146_v61 = vld [vmem:[#allocation8 + $0x5] ss:$0 sm:$0xff] }
 0x4d3   :  { %v216_v62 = vpop.permute.xlu1 %215 }
 0x4d4   :  { %v594_v63 = vsel %vm454_vm6, %v216_v62, 0 }
 0x4d5   :  { %1258 = vmatpush3.bf16.msra.mxu0 %v594_v63 }
 0x4d6   :  { %1271 = vmatprep.subr.bf16.mxu0 %v1476_v15 }
 0x4dd   :  { %v1357_v0 = vpop.eup %1356 }
 0x4de   :  { %v446_v1 = vmul.f32 %v1357_v0, %v1349_v43 }
 0x4e0   :  { %v450_v2 = vpack.c.bf16 %v446_v1, %v446_v1 }
 0x4e2   :  { %1260 = vmatmul.mubr.msk.bf16.vlgmr.msra.gmra.mxu0 %vm402_vm5, %v450_v2  ;;  %v1330_v2 = vld [vmem:[#allocation10 + $0x48] sm:$0xff]  }
 0x4e3   :  { %1275 = vmatprep.mubr.msk.bf16.mxu0 %vm1477_vm1, %v1476_v15  ;;  %1272 = vmatpush3.bf16.msra.mxu0 %v1328_v38 }
 0x4e4   :  { %1273 = vmatprep.subr.bf16.mxu0 %v1476_v15 }
 0x565   :  { %v492_v5 = vpop.f32.mrf.mxu1 }
 0x567   :  { %v1243_v6 = vpop.f32.mrf.mxu1 }
 0x568   :  { %v1147_v6 = vld [vmem:[#allocation8 + $0x6] ss:$0 sm:$0xff] }
 0x569   :  { %v495_v7 = vpop.f32.mrf.mxu1  ;;  %v538_v8 = vpop.f32.mrf.mxu0 }
 0x56a   :  { %v1169_v9 = vpack.c.bf16 %v538_v8, %v492_v5  ;;  %v1333_v5 = vld [vmem:[#allocation10 + $0x30] sm:$0xff]  }
 0x56b   :  { %v1244_v10 = vpop.f32.mrf.mxu1  ;;  %v1249_v11 = vpop.f32.mrf.mxu0 }
 0x56d   :  { %v541_v12 = vpop.f32.mrf.mxu0  ;;  %v584_v13 = vpop.f32.mrf.mxu1 }
 0x56f   :  { %v1250_v14 = vpop.f32.mrf.mxu0  ;;  %v1255_v16 = vpop.f32.mrf.mxu1 }
 0x571   :  { %v587_v17 = vpop.f32.mrf.mxu1 }
 0x573   :  { %v1256_v18 = vpop.f32.mrf.mxu1 }
 0x5a2   :  { %v630_v19 = vpop.f32.mrf.mxu0 }
 0x5a3   :  { %v1170_v20 = vpack.c.bf16 %v630_v19, %v584_v13 }
 0x5a4   :  { %v1261_v21 = vpop.f32.mrf.mxu0 }
 0x5a5   :  { %650 = vrot.lane.b32.xlu0 %v1170_v20, %s1483_s13 }
 0x5a6   :  { %v633_v22 = vpop.f32.mrf.mxu0 }
 0x5a8   :  { %v1262_v23 = vpop.f32.mrf.mxu0 }
 0x617   :  { %v651_v24 = vpop.permute.xlu0 %650 }
 0x618   :  { %v654_v25 = vsel %vm217_vm2, %v1169_v9, %v651_v24 }
 0x619   :  { %1268 = vmatmul.mubr.msk.bf16.vlgmr.msra.gmra.mxu1 %vm73_vm0, %v654_v25 }
 0x61a   :  { %1287 = vmatprep.mubr.msk.bf16.mxu1 %vm1477_vm1, %v1476_v15  ;;  %1280 = vmatpush3.bf16.msra.mxu1 %v1330_v2 }
 0x61b   :  { %1281 = vmatprep.subr.bf16.mxu1 %v1476_v15 }
 0x61e   :  { %1282 = vmatpush3.bf16.msra.mxu1 %v1331_v3 }
 0x61f   :  { %1283 = vmatprep.subr.bf16.mxu1 %v1476_v15 }
 0x622   :  { %1284 = vmatpush3.bf16.msra.mxu1 %v1332_v4 }
 0x623   :  { %1285 = vmatprep.subr.bf16.mxu1 %v1476_v15 }
 0x626   :  { %1286 = vmatpush3.bf16.msra.mxu1 %v1333_v5 }
 0x6d9   :  { %v712_v27 = vpop.f32.mrf.mxu1 }
 0x6da   :  { %v713_v28 = vadd.f32 %v1141_v26, %v712_v27 }
 0x6db   :  { %v1269_v29 = vpop.f32.mrf.mxu1 }
 0x6dc   :  { %v719_v30 = vadd.f32 %v713_v28, %v1536_v31 }
 0x6dd   :  { %v715_v33 = vpop.f32.mrf.mxu1 }
 0x6de   :  { %v716_v34 = vadd.f32 %v1141_v26, %v715_v33  ;;  %v721_v35 = vsel %vm73_vm0, %v719_v30, 0.0 }
 0x6df   :  { %722 = vadd.xlane.f32.xlu1 %v721_v35  ;;  %v1270_v36 = vpop.f32.mrf.mxu1  ;;  %v1151_v35 = vld [vmem:[#allocation8 + $0x7] ss:$0 sm:$0xff] }
 0x6e0   :  { %v720_v37 = vadd.f32 %v716_v34, %v1538_v32  ;;  %v1329_v32 = vld [vmem:[#allocation10 + $0x20] sm:$0xff]  }
 0x6e1   :  { %1274 = vmatpush3.bf16.msra.mxu0 %v1329_v32 }
 0x6e2   :  { %v724_v39 = vsel %vm73_vm0, %v720_v37, 0.0  ;;  %1291 = vmatprep.subr.bf16.mxu0 %v1476_v15 }
 0x6e3   :  { %725 = vadd.xlane.f32.xlu0 %v724_v39 }
 0x768   :  { %v723_v40 = vpop.xlane.xlu1 %722 }
 0x769   :  { %v727_v41 = vmul.f32 0.03125, %v723_v40 }
 0x76b   :  { %v729_v43 = vsub.f32 %v719_v30, %v727_v41 }
 0x76c   :  { %v726_v44 = vpop.xlane.xlu0 %725 }
 0x76d   :  { %v728_v45 = vmul.f32 0.03125, %v726_v44  ;;  %v731_v46 = vmul.f32 %v729_v43, %v729_v43 }
 0x76f   :  { %v730_v47 = vsub.f32 %v720_v37, %v728_v45  ;;  %v733_v31 = vsel %vm73_vm0, %v731_v46, 0.0 }
 0x770   :  { %734 = vadd.xlane.f32.xlu0 %v733_v31 }
 0x771   :  { %v732_v48 = vmul.f32 %v730_v47, %v730_v47 }
 0x773   :  { %v736_v49 = vsel %vm73_vm0, %v732_v48, 0.0 }
 0x774   :  { %737 = vadd.xlane.f32.xlu0 %v736_v49 }
 0x7f9   :  { %v735_v50 = vpop.xlane.xlu0 %734 }
 0x7fa   :  { %v739_v51 = vmul.f32 0.03125, %v735_v50 }
 0x7fc   :  { %v741_v42 = vadd.f32 1e-12, %v739_v51 }
 0x7fd   :  { %v738_v52 = vpop.xlane.xlu0 %737 }
 0x7fe   :  { %1358 = vrsqrt.f32 %v741_v42  ;;  %v740_v53 = vmul.f32 0.03125, %v738_v52 }
 0x800   :  { %v742_v54 = vadd.f32 1e-12, %v740_v53 }
 0x802   :  { %1360 = vrsqrt.f32 %v742_v54  ;;  %v1334_v54 = vld [vmem:[#allocation10 + $0x58] sm:$0xff]  }
 0x80b   :  { %v1359_v55 = vpop.eup %1358 }
 0x80c   :  { %v745_v56 = vmul.f32 %v1359_v55, %v729_v43  ;;  %v1335_v55 = vld [vmem:[#allocation10 + $0x50] sm:$0xff]  }
 0x80e   :  { %v752_v60 = vmul.f32 %v1145_v57, %v745_v56 }
 0x80f   :  { %v1361_v58 = vpop.eup %1360 }
 0x810   :  { %v746_v59 = vmul.f32 %v1361_v58, %v730_v47  ;;  %v759_v63 = vadd.f32 %v1146_v61, %v752_v60 }
 0x812   :  { %v753_v62 = vmul.f32 %v1145_v57, %v746_v59 }
 0x814   :  { %v760_v0 = vadd.f32 %v1146_v61, %v753_v62 }
 0x816   :  { %v761_v1 = vpack.c.bf16 %v760_v0, %v759_v63 }
 0x818   :  { %1276 = vmatmul.mubr.msk.bf16.vlgmr.msra.gmra.mxu0 %vm73_vm0, %v761_v1  ;;  %v1158_v1 = vld [vmem:[#allocation8 + $0x9] ss:$0 sm:$0xff] }
 0x819   :  { %1295 = vmatprep.mubr.msk.bf16.mxu0 %vm1477_vm1, %v1476_v15  ;;  %1292 = vmatpush3.bf16.msra.mxu0 %v1334_v54 }
 0x81a   :  { %1293 = vmatprep.subr.bf16.mxu0 %v1476_v15 }
 0x81d   :  { %1294 = vmatpush3.bf16.msra.mxu0 %v1335_v55 }
 0x81e   :  { %1299 = vmatprep.subr.bf16.mxu0 %v1476_v15 }
 0x8d8   :  { %v820_v7 = vpop.f32.mrf.mxu0 }
 0x8d9   :  { %v821_v8 = vadd.f32 %v1147_v6, %v820_v7 }
 0x8da   :  { %v1277_v9 = vpop.f32.mrf.mxu0 }
 0x8db   :  { %v827_v10 = vmul.f32 %v821_v8, %v821_v8 }
 0x8dc   :  { %v823_v11 = vpop.f32.mrf.mxu0 }
 0x8dd   :  { %v829_v12 = vmul.f32 %v827_v10, %v821_v8  ;;  %v824_v13 = vadd.f32 %v1147_v6, %v823_v11  ;;  %v1336_v10 = vld [vmem:[#allocation10 + $0x68] sm:$0xff]   ;;  %v1337_v11 = vld [vmem:[#allocation10 + $0x60] sm:$0xff]  }
 0x8de   :  { %v1278_v14 = vpop.f32.mrf.mxu0 }
 0x8df   :  { %v831_v16 = vmul.f32 0.044715, %v829_v12  ;;  %v828_v17 = vmul.f32 %v824_v13, %v824_v13  ;;  %v1159_v12 = vld [vmem:[#allocation8 + $0xa] ss:$0 sm:$0xff] }
 0x8e1   :  { %v833_v18 = vadd.f32 %v831_v16, %v821_v8  ;;  %v830_v19 = vmul.f32 %v828_v17, %v824_v13 }
 0x8e3   :  { %v835_v20 = vmul.f32 0.7978846, %v833_v18  ;;  %v832_v21 = vmul.f32 0.044715, %v830_v19 }
 0x8e5   :  { %1362 = vtanh.f32 %v835_v20  ;;  %v834_v22 = vadd.f32 %v832_v21, %v824_v13  ;;  %v1163_v21 = vld [vmem:[#allocation8 + $0xb] ss:$0 sm:$0xff] }
 0x8e7   :  { %v836_v23 = vmul.f32 0.7978846, %v834_v22 }
 0x8e9   :  { %1364 = vtanh.f32 %v836_v23 }
 0x8f2   :  { %v1363_v24 = vpop.eup %1362 }
 0x8f3   :  { %v839_v25 = vadd.f32 1.0, %v1363_v24 }
 0x8f5   :  { %v841_v27 = vmul.f32 0.5, %v839_v25 }
 0x8f6   :  { %v1365_v26 = vpop.eup %1364 }
 0x8f7   :  { %v840_v28 = vadd.f32 1.0, %v1365_v26  ;;  %v843_v30 = vmul.f32 %v841_v27, %v821_v8 }
 0x8f9   :  { %v842_v29 = vmul.f32 0.5, %v840_v28 }
 0x8fb   :  { %v844_v33 = vmul.f32 %v842_v29, %v824_v13 }
 0x8fd   :  { %v845_v34 = vpack.c.bf16 %v844_v33, %v843_v30 }
 0x8ff   :  { %1288 = vmatmul.mubr.msk.bf16.vlgmr.msra.gmra.mxu1 %vm883_vm7, %v845_v34 }
 0x9bf   :  { %v921_v36 = vpop.f32.mrf.mxu1 }
 0x9c0   :  { %v922_v37 = vadd.f32 %v1151_v35, %v921_v36 }
 0x9c1   :  { %v1289_v39 = vpop.f32.mrf.mxu1 }
 0x9c2   :  { %v928_v40 = vadd.f32 %v922_v37, %v759_v63  ;;  %v1157_v63 = vld [vmem:[#allocation8 + $0x8] ss:$0 sm:$0xff] }
 0x9c3   :  { %v924_v41 = vpop.f32.mrf.mxu1 }
 0x9c4   :  { %v925_v43 = vadd.f32 %v1151_v35, %v924_v41  ;;  %v930_v44 = vsel %vm73_vm0, %v928_v40, 0.0 }
 0x9c5   :  { %931 = vadd.xlane.f32.xlu1 %v930_v44  ;;  %v1290_v45 = vpop.f32.mrf.mxu1 }
 0x9c6   :  { %v929_v46 = vadd.f32 %v925_v43, %v760_v0 }
 0x9c8   :  { %v933_v47 = vsel %vm73_vm0, %v929_v46, 0.0 }
 0x9c9   :  { %934 = vadd.xlane.f32.xlu0 %v933_v47 }
 0xa4e   :  { %v932_v31 = vpop.xlane.xlu1 %931 }
 0xa4f   :  { %v936_v48 = vmul.f32 0.03125, %v932_v31 }
 0xa51   :  { %v938_v49 = vsub.f32 %v928_v40, %v936_v48 }
 0xa52   :  { %v935_v38 = vpop.xlane.xlu0 %934 }
 0xa53   :  { %v937_v32 = vmul.f32 0.03125, %v935_v38  ;;  %v940_v50 = vmul.f32 %v938_v49, %v938_v49 }
 0xa55   :  { %v939_v51 = vsub.f32 %v929_v46, %v937_v32  ;;  %v942_v42 = vsel %vm73_vm0, %v940_v50, 0.0 }
 0xa56   :  { %943 = vadd.xlane.f32.xlu1 %v942_v42 }
 0xa57   :  { %v941_v52 = vmul.f32 %v939_v51, %v939_v51 }
 0xa59   :  { %v945_v53 = vsel %vm73_vm0, %v941_v52, 0.0 }
 0xa5a   :  { %946 = vadd.xlane.f32.xlu0 %v945_v53 }
 0xadf   :  { %v944_v56 = vpop.xlane.xlu1 %943 }
 0xae0   :  { %v948_v57 = vmul.f32 0.03125, %v944_v56 }
 0xae2   :  { %v950_v58 = vadd.f32 1e-12, %v948_v57 }
 0xae3   :  { %v947_v59 = vpop.xlane.xlu0 %946 }
 0xae4   :  { %1366 = vrsqrt.f32 %v950_v58  ;;  %v949_v60 = vmul.f32 0.03125, %v947_v59 }
 0xae6   :  { %v951_v61 = vadd.f32 1e-12, %v949_v60 }
 0xae8   :  { %1368 = vrsqrt.f32 %v951_v61 }
 0xaf1   :  { %v1367_v62 = vpop.eup %1366 }
 0xaf2   :  { %v954_v0 = vmul.f32 %v1367_v62, %v938_v49 }
 0xaf4   :  { %v961_v2 = vmul.f32 %v1157_v63, %v954_v0 }
 0xaf5   :  { %v1369_v3 = vpop.eup %1368 }
 0xaf6   :  { %v968_v4 = vadd.f32 %v1158_v1, %v961_v2  ;;  %v955_v5 = vmul.f32 %v1369_v3, %v939_v51 }
 0xaf8   :  { %970 = vst.msk [vmem:[#allocation2] sm:$0xff] %vm73_vm0, %v968_v4  ;;  %v962_v6 = vmul.f32 %v1157_v63, %v955_v5 }
 0xafa   :  { %v969_v7 = vadd.f32 %v1158_v1, %v962_v6 }
 0xafc   :  { %971 = vst.msk [vmem:[#allocation2 + $0x8] sm:$0xff] %vm73_vm0, %v969_v7 }
 0xb03   :  { %v972_v8 = vld [vmem:[#allocation2] ss:$8 sm:$0x3] }
 0xb04   :  { %v973_v9 = vpack.c.bf16 %v972_v8, %v972_v8 }
 0xb06   :  { %1296 = vmatmul.mubr.msk.bf16.vlgmr.msra.gmra.mxu0 %vm73_vm0, %v973_v9 }
 0xb07   :  { %1303 = vmatprep.mubr.msk.bf16.mxu0 %vm1477_vm1, %v1476_v15  ;;  %1300 = vmatpush3.bf16.msra.mxu0 %v1336_v10 }
 0xb08   :  { %1301 = vmatprep.subr.bf16.mxu0 %v1476_v15 }
 0xb0b   :  { %1302 = vmatpush3.bf16.msra.mxu0 %v1337_v11 }
 0xbc6   :  { %v1032_v13 = vpop.f32.mrf.mxu0 }
 0xbc7   :  { %v1033_v14 = vadd.f32 %v1159_v12, %v1032_v13 }
 0xbc8   :  { %v1297_v16 = vpop.f32.mrf.mxu0 }
 0xbc9   :  { %1370 = vtanh.f32 %v1033_v14 }
 0xbca   :  { %v1035_v17 = vpop.f32.mrf.mxu0 }
 0xbcc   :  { %v1298_v18 = vpop.f32.mrf.mxu0 }
 0xbd6   :  { %v1371_v19 = vpop.eup %1370 }
 0xbd7   :  { %v1039_v20 = vpack.c.bf16 %v1371_v19, %v1371_v19 }
 0xbd9   :  { %1304 = vmatmul.mubr.msk.bf16.vlgmr.msra.gmra.mxu0 %vm73_vm0, %v1039_v20 }
 0xc99   :  { %v1098_v22 = vpop.f32.mrf.mxu0 }
 0xc9a   :  { %v1099_v23 = vadd.f32 %v1163_v21, %v1098_v22 }
 0xc9b   :  { %v1305_v15 = vpop.f32.mrf.mxu0 }
 0xc9c   :  { %1104 = vst [vmem:[#allocation11] sm:$0x3] %v1099_v23 }
 0xc9d   :  { %v1101_v24 = vpop.f32.mrf.mxu0 }
 0xc9e   :  { %1451 = shalt.err (!%p1448_p5)
}
 0xc9f   :  { %1114 = dma.vmem_to_hbm [thread:$0]  %s1112_s15, 32, %s1651_s4, [#allocation5]   ;;  %v1306_v25 = vpop.f32.mrf.mxu0 }
 0xca0   :  { %1466 = dma.done.wait [#allocation5], 32  }
 0xca1   :  { %1467 = vsyncadd [#allocation5], 4294967264 }
 0xca2   :  { %1118 = vsyncpa [#allocation4], 1 }
 0xca3   :  { %1119 = vsyncpa [#allocation9], 1 }
 0xca4   :  { %1120 = vsyncpa [#allocation5], 1 }
 0xca5   :  { %1121 = vsyncpa [#allocation6], 1 }

</bundles_post_ra>
